<compile_context>
chip_gen: v7x
topology: tpu7x:2x2x1
jax: 0.10.0
libtpu: 0.0.40
codegen_flags: <defaults>
</compile_context>

<pallas_src>
import functools

import jax
import jax.numpy as jnp
from jax import lax
from jax.experimental import pallas as pl
from jax.experimental.pallas import tpu as pltpu


def _channel_attention_kernel(x_ref, w1t_ref, w2t_ref, o_ref, max_ref, sum_ref,
                              *, hw, hw_tile, inv_hw):
    """Grid = (batch_groups, hw_tiles); hw axis is the (arbitrary) reduction.

    x_ref  : (b_tile, C, hw_tile) activation slice (native dtype)
    w1t_ref: (C, Cr)  first 1x1-conv weight, pre-transposed
    w2t_ref: (Cr, C)  second 1x1-conv weight, pre-transposed
    o_ref  : (1, b_tile, C) sigmoid attention output (resident across hw axis)
    max_ref/sum_ref: (b_tile, C) f32 running max / running sum scratch
    """
    k = pl.program_id(1)
    last = pl.num_programs(1) - 1

    @pl.when(k == 0)
    def _init():
        max_ref[...] = jnp.full_like(max_ref, -jnp.inf)
        sum_ref[...] = jnp.zeros_like(sum_ref)

    rem = hw % hw_tile  # static Python int

    def _accumulate(x):
        max_ref[...] = jnp.maximum(max_ref[...], jnp.max(x, axis=-1))
        sum_ref[...] = sum_ref[...] + jnp.sum(x, axis=-1)

    if rem == 0:
        # Evenly tiled: every tile is pure load + max + add (no mask code).
        _accumulate(x_ref[...].astype(jnp.float32))
    else:
        # Common path: full tiles stay mask-free.
        @pl.when(k != last)
        def _full_tile():
            _accumulate(x_ref[...].astype(jnp.float32))

        # Ragged last tile: the block overhangs HW; the overhang contents are
        # unspecified, so mask them out of both the max and the sum.
        @pl.when(k == last)
        def _ragged_tile():
            x = x_ref[...].astype(jnp.float32)
            valid = lax.broadcasted_iota(jnp.int32, (1, 1, hw_tile), 2) < rem
            max_ref[...] = jnp.maximum(
                max_ref[...], jnp.max(jnp.where(valid, x, -jnp.inf), axis=-1))
            sum_ref[...] = sum_ref[...] + jnp.sum(jnp.where(valid, x, 0.0),
                                                  axis=-1)

    @pl.when(k == last)
    def _finalize():
        pooled_max = max_ref[...]
        pooled_avg = sum_ref[...] * inv_hw
        w1t = w1t_ref[...]
        w2t = w2t_ref[...]

        def se(v):  # 1x1 convs on (b_tile, C) pooled stats == plain matmuls
            h = jnp.dot(v, w1t, preferred_element_type=jnp.float32)
            h = jnp.maximum(h, 0.0)                                   # ReLU
            return jnp.dot(h, w2t, preferred_element_type=jnp.float32)

        att = jax.nn.sigmoid(se(pooled_max) + se(pooled_avg))
        o_ref[...] = att[None, :, :].astype(o_ref.dtype)


def _pick_b_tile(batch, channels, itemsize, budget_bytes):
    """Largest divisor of batch (<=8) whose minimal 128-lane block fits the
    budget, preferring >=2 steps on the parallel axis (v7x megacore)."""
    divisors = [d for d in range(1, min(batch, 8) + 1) if batch % d == 0]
    fits = [d for d in divisors if d * channels * itemsize * 128 <= budget_bytes]
    if not fits:
        fits = [1]
    multi = [d for d in fits if batch // d >= 2]
    return max(multi) if multi else max(fits)


def channel_attention(x_nchw, w1, w2, *, x_block_budget_bytes=2 * 1024 * 1024):
    """x_nchw: (B, C, H, W); w1: (C//r, C); w2: (C, C//r). Returns (B, C, 1, 1)."""
    B, C, H, W = x_nchw.shape
    Cr = w1.shape[0]
    HW = H * W
    x3 = x_nchw.reshape(B, C, HW)            # layout-preserving; no dtype cast
    itemsize = x3.dtype.itemsize

    b_tile = _pick_b_tile(B, C, itemsize, x_block_budget_bytes)
    num_b = B // b_tile

    # Spatial tiling: lane tiles in multiples of 128 within the block budget.
    max_lanes = x_block_budget_bytes // max(1, b_tile * C * itemsize)
    max_lanes = max(128, (max_lanes // 128) * 128)
    if HW <= max_lanes:
        hw_tile = HW                          # single tile; block == full dim
    else:
        hw_tile = max_lanes                   # multiple of 128
    num_hw = pl.cdiv(HW, hw_tile)             # ragged last tile masked in-kernel

    # Pre-transpose weights to (K, N): both SE matmuls contract on rhs dim 0,
    # so no Mosaic-inserted transpose of the resident weights in the epilogue.
    w1t = jnp.swapaxes(w1, 0, 1)              # (C, Cr)
    w2t = jnp.swapaxes(w2, 0, 1)              # (Cr, C)

    kernel = functools.partial(_channel_attention_kernel,
                               hw=HW, hw_tile=hw_tile, inv_hw=1.0 / HW)

    cost = pl.CostEstimate(
        flops=2 * B * C * HW + 8 * B * C * Cr,
        transcendentals=B * C,
        bytes_accessed=B * C * HW * itemsize + B * C * itemsize + 2 * C * Cr * 4,
    )

    out = pl.pallas_call(
        kernel,
        out_shape=jax.ShapeDtypeStruct((num_b, b_tile, C), x_nchw.dtype),
        grid_spec=pltpu.PrefetchScalarGridSpec(
            num_scalar_prefetch=0,
            grid=(num_b, num_hw),
            in_specs=[
                pl.BlockSpec((b_tile, C, hw_tile), lambda b, k: (b, 0, k)),
                pl.BlockSpec((C, Cr), lambda b, k: (0, 0)),   # resident weights
                pl.BlockSpec((Cr, C), lambda b, k: (0, 0)),
            ],
            out_specs=pl.BlockSpec((1, b_tile, C), lambda b, k: (b, 0, 0)),
            scratch_shapes=[pltpu.VMEM((b_tile, C), jnp.float32),   # running max
                            pltpu.VMEM((b_tile, C), jnp.float32)],  # running sum
        ),
        compiler_params=pltpu.CompilerParams(
            dimension_semantics=("parallel", "arbitrary")),
        cost_estimate=cost,
    )(x3, w1t, w2t)
    # TODO(synk): on v7x, pipeline_mode=pl.Buffered(3) on the x BlockSpec can
    # hide per-step DMA issue latency once blocks are 2-4 MiB; left at the
    # default depth for portability across jax versions.
    return out.reshape(B, C, 1, 1)


if __name__ == "__main__":
    B, C, H, W = 2, 64, 18, 18               # HW = 324 (not a multiple of 128)
    reduction = 16
    Cr = C // reduction

    key = jax.random.PRNGKey(0)
    kx, k1, k2 = jax.random.split(key, 3)
    x = jax.random.normal(kx, (B, C, H, W), dtype=jnp.float32)
    # Conv2d(C, Cr, 1, bias=False).weight -> (Cr, C, 1, 1) squeezed to (Cr, C)
    w1 = jax.random.normal(k1, (Cr, C), dtype=jnp.float32) * 0.1
    # Conv2d(Cr, C, 1, bias=False).weight -> (C, Cr, 1, 1) squeezed to (C, Cr)
    w2 = jax.random.normal(k2, (C, Cr), dtype=jnp.float32) * 0.1

    # Pure-JAX reference.
    xm = jnp.max(x.reshape(B, C, -1), axis=-1)
    xa = jnp.mean(x.reshape(B, C, -1), axis=-1)
    se = lambda v: jnp.maximum(v @ w1.T, 0.0) @ w2.T
    ref = jax.nn.sigmoid(se(xm) + se(xa)).reshape(B, C, 1, 1)

    # Default (2 MiB) budget: single hw tile, no masking path.
    out = channel_attention(x, w1, w2)
    jax.block_until_ready(out)
    assert out.shape == (B, C, 1, 1)
    assert jnp.allclose(out, ref, atol=1e-5, rtol=1e-5), float(
        jnp.max(jnp.abs(out - ref)))

    # Tiny budget: exercises the multi-tile hw reduction and the masked ragged
    # last tile (HW=324 -> 256-lane tiles, last tile has 68 valid lanes).
    out_small = channel_attention(x, w1, w2, x_block_budget_bytes=64 * 1024)
    jax.block_until_ready(out_small)
    assert jnp.allclose(out_small, ref, atol=1e-5, rtol=1e-5), float(
        jnp.max(jnp.abs(out_small - ref)))

    print("KERNEL_OK")
</pallas_src>

<mosaic_0001>
module attributes {stable_mosaic.version = 11 : i64} {
  func.func @_channel_attention_kernel(%arg0: i32, %arg1: i32, %arg2: memref<1x64x324xf32, #tpu.memory_space<vmem>>, %arg3: memref<64x4xf32, #tpu.memory_space<vmem>>, %arg4: memref<4x64xf32, #tpu.memory_space<vmem>>, %arg5: memref<1x1x64xf32, #tpu.memory_space<vmem>>, %arg6: memref<1x64xf32, #tpu.memory_space<vmem>>, %arg7: memref<1x64xf32, #tpu.memory_space<vmem>>) attributes {dimension_semantics = [#tpu.dimension_semantics<parallel>, #tpu.dimension_semantics<arbitrary>], iteration_bounds = array<i64: 2, 1>, scalar_prefetch = 0 : i64, scratch_operands = 2 : i64, tpu.core_type = #tpu.core_type<tc>, window_params = [{transform_indices = @transform_0, window_bounds = array<i64: 1, 64, 324>}, {pipeline_mode = #tpu.pipeline_mode<synchronous>, transform_indices = @transform_1, window_bounds = array<i64: 64, 4>}, {pipeline_mode = #tpu.pipeline_mode<synchronous>, transform_indices = @transform_2, window_bounds = array<i64: 4, 64>}, {transform_indices = @transform_3, window_bounds = array<i64: 1, 1, 64>}]} {
    %c0_i32 = arith.constant 0 : i32
    %0 = arith.cmpi eq, %arg1, %c0_i32 : i32
    %1 = arith.extui %0 : i1 to i32
    %c0_i32_0 = arith.constant 0 : i32
    %2 = arith.cmpi ne, %1, %c0_i32_0 : i32
    scf.if %2 {
      %cst_14 = arith.constant 0xFF800000 : f32
      %15 = vector.broadcast %cst_14 : f32 to vector<1x64xf32>
      %c0_15 = arith.constant 0 : index
      %c0_16 = arith.constant 0 : index
      %16 = vector.load %arg6[%c0_15, %c0_16] : memref<1x64xf32, #tpu.memory_space<vmem>>, vector<1x64xf32>
      tpu.vector_store %arg6[%c0_15, %c0_16], %15 {strides = array<i32>} : memref<1x64xf32, #tpu.memory_space<vmem>>, vector<1x64xf32>,
      %cst_17 = arith.constant 0.000000e+00 : f32
      %17 = vector.broadcast %cst_17 : f32 to vector<1x64xf32>
      %c0_18 = arith.constant 0 : index
      %c0_19 = arith.constant 0 : index
      %18 = vector.load %arg7[%c0_18, %c0_19] : memref<1x64xf32, #tpu.memory_space<vmem>>, vector<1x64xf32>
      tpu.vector_store %arg7[%c0_18, %c0_19], %17 {strides = array<i32>} : memref<1x64xf32, #tpu.memory_space<vmem>>, vector<1x64xf32>,
    } else {
    }
    %c0 = arith.constant 0 : index
    %c0_1 = arith.constant 0 : index
    %c0_2 = arith.constant 0 : index
    %3 = vector.load %arg2[%c0, %c0_1, %c0_2] : memref<1x64x324xf32, #tpu.memory_space<vmem>>, vector<1x64x324xf32>
    %c0_3 = arith.constant 0 : index
    %c0_4 = arith.constant 0 : index
    %4 = vector.load %arg6[%c0_3, %c0_4] : memref<1x64xf32, #tpu.memory_space<vmem>>, vector<1x64xf32>
    %cst = arith.constant dense<0xFF800000> : vector<1x64xf32>
    %5 = vector.multi_reduction <maximumf>, %3, %cst [2] : vector<1x64x324xf32> to vector<1x64xf32>
    %6 = arith.maximumf %4, %5 : vector<1x64xf32>
    %c0_5 = arith.constant 0 : index
    %c0_6 = arith.constant 0 : index
    %7 = vector.load %arg6[%c0_5, %c0_6] : memref<1x64xf32, #tpu.memory_space<vmem>>, vector<1x64xf32>
    tpu.vector_store %arg6[%c0_5, %c0_6], %6 {strides = array<i32>} : memref<1x64xf32, #tpu.memory_space<vmem>>, vector<1x64xf32>,
    %c0_7 = arith.constant 0 : index
    %c0_8 = arith.constant 0 : index
    %8 = vector.load %arg7[%c0_7, %c0_8] : memref<1x64xf32, #tpu.memory_space<vmem>>, vector<1x64xf32>
    %cst_9 = arith.constant dense<0.000000e+00> : vector<1x64xf32>
    %9 = vector.multi_reduction <add>, %3, %cst_9 [2] : vector<1x64x324xf32> to vector<1x64xf32>
    %10 = arith.addf %8, %9 : vector<1x64xf32>
    %c0_10 = arith.constant 0 : index
    %c0_11 = arith.constant 0 : index
    %11 = vector.load %arg7[%c0_10, %c0_11] : memref<1x64xf32, #tpu.memory_space<vmem>>, vector<1x64xf32>
    tpu.vector_store %arg7[%c0_10, %c0_11], %10 {strides = array<i32>} : memref<1x64xf32, #tpu.memory_space<vmem>>, vector<1x64xf32>,
    %c0_i32_12 = arith.constant 0 : i32
    %12 = arith.cmpi eq, %arg1, %c0_i32_12 : i32
    %13 = arith.extui %12 : i1 to i32
    %c0_i32_13 = arith.constant 0 : i32
    %14 = arith.cmpi ne, %13, %c0_i32_13 : i32
    scf.if %14 {
      %c0_14 = arith.constant 0 : index
      %c0_15 = arith.constant 0 : index
      %15 = vector.load %arg6[%c0_14, %c0_15] : memref<1x64xf32, #tpu.memory_space<vmem>>, vector<1x64xf32>
      %c0_16 = arith.constant 0 : index
      %c0_17 = arith.constant 0 : index
      %16 = vector.load %arg7[%c0_16, %c0_17] : memref<1x64xf32, #tpu.memory_space<vmem>>, vector<1x64xf32>
      %cst_18 = arith.constant 0.00308641978 : f32
      %17 = vector.broadcast %cst_18 : f32 to vector<1x64xf32>
      %18 = arith.mulf %16, %17 : vector<1x64xf32>
      %c0_19 = arith.constant 0 : index
      %c0_20 = arith.constant 0 : index
      %19 = vector.load %arg3[%c0_19, %c0_20] : memref<64x4xf32, #tpu.memory_space<vmem>>, vector<64x4xf32>
      %c0_21 = arith.constant 0 : index
      %c0_22 = arith.constant 0 : index
      %20 = vector.load %arg4[%c0_21, %c0_22] : memref<4x64xf32, #tpu.memory_space<vmem>>, vector<4x64xf32>
      %cst_23 = arith.constant dense<0.000000e+00> : vector<1x4xf32>
      %21 = tpu.matmul %15, %19, %cst_23 {dimension_numbers = #tpu.dot_dimension_numbers<[1], [0], [0], [1], [0, 0, 1, 1], [], []>} : vector<1x64xf32>, vector<64x4xf32>, vector<1x4xf32> -> vector<1x4xf32>
      %cst_24 = arith.constant 0.000000e+00 : f32
      %22 = vector.broadcast %cst_24 : f32 to vector<1x4xf32>
      %23 = arith.maximumf %21, %22 : vector<1x4xf32>
      %cst_25 = arith.constant dense<0.000000e+00> : vector<1x64xf32>
      %24 = tpu.matmul %23, %20, %cst_25 {dimension_numbers = #tpu.dot_dimension_numbers<[1], [0], [0], [1], [0, 0, 1, 1], [], []>} : vector<1x4xf32>, vector<4x64xf32>, vector<1x64xf32> -> vector<1x64xf32>
      %cst_26 = arith.constant dense<0.000000e+00> : vector<1x4xf32>
      %25 = tpu.matmul %18, %19, %cst_26 {dimension_numbers = #tpu.dot_dimension_numbers<[1], [0], [0], [1], [0, 0, 1, 1], [], []>} : vector<1x64xf32>, vector<64x4xf32>, vector<1x4xf32> -> vector<1x4xf32>
      %cst_27 = arith.constant 0.000000e+00 : f32
      %26 = vector.broadcast %cst_27 : f32 to vector<1x4xf32>
      %27 = arith.maximumf %25, %26 : vector<1x4xf32>
      %cst_28 = arith.constant dense<0.000000e+00> : vector<1x64xf32>
      %28 = tpu.matmul %27, %20, %cst_28 {dimension_numbers = #tpu.dot_dimension_numbers<[1], [0], [0], [1], [0, 0, 1, 1], [], []>} : vector<1x4xf32>, vector<4x64xf32>, vector<1x64xf32> -> vector<1x64xf32>
      %29 = arith.addf %24, %28 : vector<1x64xf32>
      %30 = arith.negf %29 : vector<1x64xf32>
      %31 = math.exp %30 : vector<1x64xf32>
      %cst_29 = arith.constant 1.000000e+00 : f32
      %32 = vector.broadcast %cst_29 : f32 to vector<1x64xf32>
      %33 = arith.addf %32, %31 : vector<1x64xf32>
      %34 = arith.divf %32, %33 : vector<1x64xf32>
      %35 = vector.shape_cast %34 : vector<1x64xf32> to vector<1x1x64xf32>
      %c0_30 = arith.constant 0 : index
      %c0_31 = arith.constant 0 : index
      %c0_32 = arith.constant 0 : index
      %36 = vector.load %arg5[%c0_30, %c0_31, %c0_32] : memref<1x1x64xf32, #tpu.memory_space<vmem>>, vector<1x1x64xf32>
      tpu.vector_store %arg5[%c0_30, %c0_31, %c0_32], %35 {strides = array<i32>} : memref<1x1x64xf32, #tpu.memory_space<vmem>>, vector<1x1x64xf32>,
    } else {
    }
    return
  }
  func.func @transform_0(%arg0: i32, %arg1: i32) -> (i32, i32, i32) {
    %c0_i32 = arith.constant 0 : i32
    %c0_i32_0 = arith.constant 0 : i32
    return %arg0, %c0_i32, %arg1 : i32, i32, i32
  }
  func.func @transform_1(%arg0: i32, %arg1: i32) -> (i32, i32) {
    %c0_i32 = arith.constant 0 : i32
    %c0_i32_0 = arith.constant 0 : i32
    %c0_i32_1 = arith.constant 0 : i32
    return %c0_i32, %c0_i32_0 : i32, i32
  }
  func.func @transform_2(%arg0: i32, %arg1: i32) -> (i32, i32) {
    %c0_i32 = arith.constant 0 : i32
    %c0_i32_0 = arith.constant 0 : i32
    %c0_i32_1 = arith.constant 0 : i32
    return %c0_i32, %c0_i32_0 : i32, i32
  }
  func.func @transform_3(%arg0: i32, %arg1: i32) -> (i32, i32, i32) {
    %c0_i32 = arith.constant 0 : i32
    %c0_i32_0 = arith.constant 0 : i32
    %c0_i32_1 = arith.constant 0 : i32
    return %arg0, %c0_i32, %c0_i32_0 : i32, i32, i32
  }
}

</mosaic_0001>

<bundles_post_ra>
// kernel: tpu_custom_call.1
= control target key start
LH: loop header
LB: loop body
LE: loop exit
PB: predicated region body
PF: predicated region fallthrough
CT: control target
= control target key end

     0   :  { %8 = vsyncpa [#allocation5], 0  ;;  %s3132_s0 = inlined_call_operand.hbm [shape: f32[2,64,324], index: 0, kind: input, shape index: {}]   ;;  %s3133_s1 = inlined_call_operand.vmem [shape: f32[64,4], index: 1, kind: input, shape index: {}]   ;;  %s3134_s2 = inlined_call_operand.vmem [shape: f32[4,64], index: 2, kind: input, shape index: {}]   ;;  %s3135_s3 = inlined_call_operand.hbm [shape: f32[2,1,64], index: 3, kind: output, shape index: {}]  }
   0x1   :  { %10 = vsyncpa [#allocation5 + $0x1], 0 }
   0x2   :  { %11 = vsyncpa [#allocation6], 0 }
   0x3   :  { %13 = vsyncpa [#allocation6 + $0x1], 0  ;;  %s2554_s12 = smov 0   ;;  %s2556_s13 = smov 0  }
   0x4   :  { %s2558_s14 = smov 0   ;;  %s2560_s15 = smov 0  }
   0x5   :  { %s2562_s16 = smov 0   ;;  %s2564_s17 = smov 0  }
   0x6 LB: > { %s2220_s18 = sadd.s32 4294967295, %s2522_s17   ;;  %s2221_s19 = sadd.s32 4294967294, %s2522_s17   ;;  %s2522_s17 = sphi %s2564_s17, %s19_s17   ;;  %s2518_s16 = sphi %s2562_s16, %s3150_s16   ;;  %s2514_s15 = sphi %s2560_s15, %s3149_s15   ;;  %s2510_s14 = sphi %s2558_s14, %s3148_s14   ;;  %s2506_s13 = sphi %s2556_s13, %s3147_s13   ;;  %s2502_s12 = sphi %s2554_s12, %s3146_s12  }
   0x7   : > { %s31_s20 = sadd.s32 1, %s2518_s16  ;;  %s40_s21 = sadd.s32 1, %s2510_s14 }
   0x8   : > { %p33_p0 = scmp.ge.s32.totalorder %s31_s20, 2  ;;  %p47_p1 = scmp.ne.s32.totalorder %s2510_s14, %s2506_s13 }
   0x9   : > { %p48_p2 = scmp.eq.s32.totalorder %s2522_s17, 0  ;;  %p53_p3 = scmp.ne.s32.totalorder %s2506_s13, %s2502_s12 }
   0xa   : > { %s3152_s20 = smov (%p33_p0, %s31_s20), 0  ;;  %p54_p5 = scmp.eq.s32.totalorder %s2220_s18, 0 }
   0xb   : > { %p2595_p4 = por %p48_p2, %p47_p1  ;;  %s35_s23 = ssub.s32 %s2518_s16, %s3152_s20 }
   0xc   : > { %p119_p6 = scmp.eq.s32.totalorder %s2220_s18, 1  ;;  %p38_p7 = scmp.eq.s32.totalorder %s35_s23, 0 }
   0xd   : > { %p2601_p8 = por %p54_p5, %p53_p3  ;;  %p125_p10 = scmp.eq.s32.totalorder %s2221_s19, 1 }
   0xe   : > { %p2605_p9 = por %p119_p6, %p47_p1  ;;  %p2346_p13 = scmp.lt.s32.totalorder %s2522_s17, 2 }
   0xf   : > { %s2610_s26 = scalar_select %p38_p7, %s2510_s14, %s40_s21  }
  0x10   : > { %s3139_s25 = scalar_select %p2605_p9, 1, 0 }
  0x11   : > { %p2612_p11 = por %p125_p10, %p53_p3  ;;  %s151_s28 = sand.u32 1, %s2510_s14  }
  0x12   : > { %s2331_s29 = smul.u32 192, %s151_s28  ;;  %p2622_p0 = pnand %p2346_p13, %p2595_p4 }
  0x13   : > { %s3140_s27 = scalar_select %p2612_p11, 1, 0 }
  0x14   : > { %s2332_s30 = smul.u32 3072, %s2518_s16  ;;  %s155_s8 = scalar_lea.vmem [#allocation4], %s2331_s29 }
  0x15   : > { %s164_s9 = sshll.u32 %s155_s8, 4  ;;  %s2634_s10 = scalar_lea.sflag [#allocation5], %s151_s28  ;;  %s2631_s9 = int_to_ptr.vmem [resolvable:$true] %s164_s9 }
  0x16   : > { %s2629_s7 = scalar_lea.hbm %s3132_s0, %s2332_s30  ;;  %p2412_p3 = pneg %p2622_p0 }
  0x17   : > { %s2410_s11 = scalar_lea.hbm %s2629_s7, 3072  ;;  %s2415_s21 = scalar_lea.hbm %s3132_s0, 6144 }
  0x18   : > { %p2411_p2 = scmp.ne.s32.totalorder %s2629_s7, %s2410_s11  ;;  %p2416_p6 = scmp.lt.u32.totalorder %s2629_s7, %s3132_s0 }
  0x19   : > { %p2417_p7 = scmp.lt.u32.totalorder %s2415_s21, %s2410_s11  ;;  %p2419_p13 = scmp.lt.u32.totalorder %s2410_s11, %s2629_s7 }
  0x1a   : > { %p2413_p4 = pnand %p2412_p3, %p2411_p2 }
  0x1b   : > { %p2418_p10 = por %p2417_p7, %p2416_p6 }
  0x1c   : > { %p2414_p5 = pneg %p2413_p4 }
  0x1d   : > { %p2420_p12 = por %p2419_p13, %p2418_p10 }
  0x1f   : > { %p2421_p1 = pnand %p2420_p12, %p2414_p5 }
  0x21   : > { %2424 = shalt.err (!%p2421_p1)
}
  0x22   : > { %s2425_s28 = scalar_lea.vmem %s2631_s9, 3072  ;;  %s2524_s29 = smov [#allocation4]  }
  0x23   : > { %p2426_p2 = scmp.ne.s32.totalorder %s2631_s9, %s2425_s28  ;;  %s2430_s30 = sshll.u32 %s2524_s29, 4  ;;  %s2431_s30 = int_to_ptr.vmem [resolvable:$false] %s2430_s30 }
  0x24   : > { %s2432_s5 = scalar_lea.vmem %s2431_s30, 6144  ;;  %p2433_p9 = scmp.lt.s32.totalorder %s2631_s9, %s2431_s30 }
  0x25   : > { %p2428_p4 = pnand %p2426_p2, %p2412_p3  ;;  %p2434_p6 = scmp.lt.s32.totalorder %s2432_s5, %s2425_s28 }
  0x27   : > { %p2429_p11 = pneg %p2428_p4  ;;  %p2435_p7 = por %p2434_p6, %p2433_p9 }
  0x29   : > { %p2436_p10 = pnand %p2435_p7, %p2429_p11 }
  0x2b   : > { %2439 = shalt.err (!%p2436_p10)
}
  0x2c   : > { %s2525_s6 = smov 384   ;;  %s2526_s8 = smov 24  }
  0x2d   : > { %2341 = dma.hbm_to_vmem [thread:$0]  (!%p2622_p0), %s2629_s7, 3072, %s2631_s9, %s2634_s10, %s2525_s6, %s2525_s6, %s2526_s8  }
  0x2e   : > { %p172_p12 = scmp.lt.s32.totalorder %s2522_s17, 3  ;;  %p3142_p1 = scmp.ge.s32.totalorder %s2522_s17, 1 }
  0x30   : > { %p173_p3 = pnand %p3142_p1, %p172_p12 }
  0x31   : > { %s2666_s11 = sand.u32 (!%p173_p3), 1, %s2506_s13  }
  0x32   : > { %176 = sbr.rel (%p173_p3) target bundleno = 910 (0x38e), region = 32  ;;  %s179_s19 = scalar_lea.sflag (!%p173_p3), [#allocation5], %s2666_s11 }
  0x33   : > { %s2333_s18 = smul.u32 (!%p173_p3), 192, %s2666_s11 }
  0x35   : > { %s2670_s21 = scalar_lea.vmem (!%p173_p3), [#allocation4], %s2333_s18 }
  0x39   : > { %2493 = dma.done.wait (%p2601_p8), %s179_s19, 3072  }
  0x3a   : > { %2495 = vsyncadd (%p2601_p8), %s179_s19, 4294964224  ;;  %vm238_vm0 = vcmask 556032   ;;  %v212_v0 = vld [vmem:[%s2670_s21] sm:$0xff]  ;;  %v213_v1 = vld [vmem:[%s2670_s21 + $0x8] sm:$0xff]  ;;  %vm209_vm1 = vcmask 516096   ;;  %vm2532_vm2 = vmmov 0  }
  0x3b   : > { %v214_v2 = vld [vmem:[%s2670_s21 + $0x10] sm:$0xff]  ;;  %v1032_v3 = vadd.f32 %v213_v1, %v212_v0  ;;  %v219_v6 = vld [vmem:[%s2670_s21 + $0x38] sm:$0xff]  ;;  %v220_v7 = vld [vmem:[%s2670_s21 + $0x40] sm:$0xff]  ;;  %v237_v13 = vmax.f32 %v212_v0, %v213_v1  ;;  %vm969_vm3 = vcmask 130112   ;;  %vm976_vm4 = vcmask 195712   ;;  %s2233_s7 = sshll.u32 %s2514_s15, 4 }
  0x3c   : > { %v1033_v4 = vsel %vm238_vm0, %v214_v2, 0.0  ;;  %v218_v5 = vld [vmem:[%s2670_s21 + $0x30] sm:$0xff]  ;;  %v1043_v9 = vsel %vm238_vm0, %v220_v7, 0.0  ;;  %v215_v10 = vld [vmem:[%s2670_s21 + $0x18] sm:$0xff]  ;;  %v216_v11 = vld [vmem:[%s2670_s21 + $0x20] sm:$0xff]  ;;  %v239_v17 = vsel %vm238_vm0, %v214_v2, -inf  ;;  %s3082_s28 = scalar_lea.hbm %s3135_s3, %s2233_s7 }
  0x3d   : > { %v1042_v8 = vadd.f32 %v219_v6, %v218_v5  ;;  %v217_v12 = vld [vmem:[%s2670_s21 + $0x28] sm:$0xff]  ;;  %v1034_v14 = vadd.f32 %v1033_v4, %v1032_v3  ;;  %v1037_v15 = vadd.f32 %v216_v11, %v215_v10  ;;  %v222_v19 = vld [vmem:[%s2670_s21 + $0x50] sm:$0xff]  ;;  %v223_v21 = vld [vmem:[%s2670_s21 + $0x58] sm:$0xff]  ;;  %v243_v23 = vmax.f32 %v215_v10, %v216_v11  ;;  %s203_s9 = scalar_lea.vmem [#allocation7], %s2666_s11  ;;  %s2131_s29 = scalar_lea.sflag [#allocation6], %s2666_s11 }
  0x3e   : > { %v1038_v16 = vsel %vm238_vm0, %v217_v12, 0.0  ;;  %v221_v18 = vld [vmem:[%s2670_s21 + $0x48] sm:$0xff]  ;;  %v240_v24 = vmax.f32 %v237_v13, %v239_v17  ;;  %v244_v26 = vsel %vm238_vm0, %v217_v12, -inf  ;;  %v1048_v27 = vsel %vm238_vm0, %v223_v21, 0.0  ;;  %v224_v28 = vld [vmem:[%s2670_s21 + $0x60] sm:$0xff]  ;;  %v226_v30 = vld [vmem:[%s2670_s21 + $0x70] sm:$0xff] }
  0x3f   : > { %v1044_v20 = vadd.f32 %v1043_v9, %v1042_v8  ;;  %1035 = vadd.xlane.f32.xlu0 %v1034_v14  ;;  %v1039_v22 = vadd.f32 %v1038_v16, %v1037_v15  ;;  %v1047_v25 = vadd.f32 %v222_v19, %v221_v18  ;;  %v225_v29 = vld [vmem:[%s2670_s21 + $0x68] sm:$0xff]  ;;  %v245_v31 = vmax.f32 %v243_v23, %v244_v26  ;;  %v227_v37 = vld [vmem:[%s2670_s21 + $0x78] sm:$0xff]  ;;  %v228_v38 = vld [vmem:[%s2670_s21 + $0x80] sm:$0xff]  ;;  %s2143_s10 = sshll.u32 %s203_s9, 4  ;;  %p3143_p9 = scmp.ne.s32.totalorder %s3139_s25, 0  ;;  %s3084_s10 = int_to_ptr.vmem [resolvable:$true] %s2143_s10 }
  0x40   : > { %v248_v32 = vmax.f32 %v218_v5, %v219_v6  ;;  %v1052_v34 = vadd.f32 %v225_v29, %v224_v28  ;;  %v249_v35 = vsel %vm238_vm0, %v220_v7, -inf  ;;  %v1053_v36 = vsel %vm238_vm0, %v226_v30, 0.0  ;;  %v229_v39 = vld [vmem:[%s2670_s21 + $0x88] sm:$0xff]  ;;  %v230_v46 = vld [vmem:[%s2670_s21 + $0x90] sm:$0xff]  ;;  %v231_v47 = vld [vmem:[%s2670_s21 + $0x98] sm:$0xff]  ;;  %s2440_s30 = scalar_lea.vmem %s3084_s10, 16 }
  0x41   : > { %1045 = vadd.xlane.f32.xlu1 %v1044_v20  ;;  %v1049_v33 = vadd.f32 %v1048_v27, %v1047_v25  ;;  %v253_v41 = vmax.f32 %v221_v18, %v222_v19  ;;  %v1057_v43 = vadd.f32 %v228_v38, %v227_v37  ;;  %v254_v44 = vsel %vm238_vm0, %v223_v21, -inf  ;;  %v232_v48 = vld [vmem:[%s2670_s21 + $0xa0] sm:$0xff]  ;;  %v233_v55 = vld [vmem:[%s2670_s21 + $0xa8] sm:$0xff]  ;;  %v234_v56 = vld [vmem:[%s2670_s21 + $0xb0] sm:$0xff]  ;;  %p2441_p8 = scmp.ne.s32.totalorder %s3084_s10, %s2440_s30  ;;  %s2533_s15 = smov [#allocation7]  }
  0x42   : > { %v250_v40 = vmax.f32 %v248_v32, %v249_v35  ;;  %v1054_v42 = vadd.f32 %v1053_v36, %v1052_v34  ;;  %v1058_v45 = vsel %vm238_vm0, %v229_v39, 0.0  ;;  %v258_v50 = vmax.f32 %v224_v28, %v225_v29  ;;  %v235_v57 = vld [vmem:[%s2670_s21 + $0xb8] sm:$0xff]  ;;  %s2444_s5 = sshll.u32 %s2533_s15, 4  ;;  %s2445_s5 = int_to_ptr.vmem [resolvable:$false] %s2444_s5 }
  0x43   : > { %1040 = vadd.xlane.f32.xlu0 %v1039_v22  ;;  %v255_v49 = vmax.f32 %v253_v41, %v254_v44  ;;  %v1059_v51 = vadd.f32 %v1058_v45, %v1057_v43  ;;  %v1062_v52 = vadd.f32 %v231_v47, %v230_v46  ;;  %v259_v53 = vsel %vm238_vm0, %v226_v30, -inf  ;;  %p2442_p11 = pnand %p2441_p8, %p3143_p9  ;;  %s2446_s6 = scalar_lea.vmem %s2445_s5, 32 }
  0x44   : > { %v1063_v54 = vsel %vm238_vm0, %v232_v48, 0.0  ;;  %v260_v58 = vmax.f32 %v258_v50, %v259_v53  ;;  %v263_v59 = vmax.f32 %v227_v37, %v228_v38  ;;  %v1067_v61 = vadd.f32 %v234_v56, %v233_v55  ;;  %p2447_p5 = scmp.lt.s32.totalorder %s3084_s10, %s2445_s5  ;;  %p2448_p13 = scmp.lt.s32.totalorder %s2446_s6, %s2440_s30 }
  0x45   : > { %241 = vmax.xlane.f32.xlu1 %v240_v24  ;;  %v1064_v60 = vadd.f32 %v1063_v54, %v1062_v52  ;;  %v264_v62 = vsel %vm238_vm0, %v229_v39, -inf  ;;  %v1068_v63 = vsel %vm238_vm0, %v235_v57, 0.0  ;;  %v268_v1 = vmax.f32 %v230_v46, %v231_v47  ;;  %p2443_p0 = pneg %p2442_p11 }
  0x46   : > { %v265_v0 = vmax.f32 %v263_v59, %v264_v62  ;;  %v1069_v2 = vadd.f32 %v1068_v63, %v1067_v61  ;;  %v273_v3 = vmax.f32 %v233_v55, %v234_v56  ;;  %v269_v4 = vsel %vm238_vm0, %v232_v48, -inf  ;;  %p2449_p2 = por %p2448_p13, %p2447_p5 }
  0x47   : > { %246 = vmax.xlane.f32.xlu0 %v245_v31  ;;  %v274_v5 = vsel %vm238_vm0, %v235_v57, -inf  ;;  %v2527_v6 = vmov 0   ;;  %v270_v7 = vmax.f32 %v268_v1, %v269_v4  ;;  %v286_v9 = vlaneseq }
  0x48   : > { %2404 = vset.pattern.permute.xlu0 %v2527_v6  ;;  %2405 = vset.pattern.permute.xlu1 %v2527_v6  ;;  %v275_v8 = vmax.f32 %v273_v3, %v274_v5  ;;  %v2528_v10 = vmov 1966171168   ;;  %vm983_vm5 = vcmask 261312   ;;  %vm990_vm6 = vcmask 326912   ;;  %p2450_p4 = pnand %p2449_p2, %p2443_p0 }
  0x49   : > { %1050 = vadd.xlane.f32.xlu1 %v1049_v33  ;;  %v547_v11 = vunpack.c.l.s4 %v2528_v10  ;;  %v2717_v12 = vshrl.u32 %v286_v9, 7  ;;  %vm997_vm7 = vcmask 392512   ;;  %vm1004_vm8 = vcmask 458112  }
  0x4a   : > { %vm1011_vm9 = vcmask 523712   ;;  %vm1823_vm10 = vcmask 523264   ;;  %vm1976_vm11 = vcmask 1043456   ;;  %vm1972_vm12 = vcmask 31744  }
  0x4b   : > { %251 = vmax.xlane.f32.xlu0 %v250_v40  ;;  %v548_v13 = vunpack.c.0.s8 %v547_v11  ;;  %v2720_v14 = vsub.s32 0, %v2717_v12  ;;  %v2723_v15 = vsub.s32 1, %v2717_v12  ;;  %v2726_v16 = vsub.s32 2, %v2717_v12 }
  0x4c   : > { %v2729_v17 = vsub.s32 3, %v2717_v12  ;;  %v2732_v18 = vsub.s32 4, %v2717_v12  ;;  %v2735_v19 = vsub.s32 5, %v2717_v12  ;;  %v2738_v20 = vsub.s32 6, %v2717_v12 }
  0x4d   : > { %1055 = vadd.xlane.f32.xlu1 %v1054_v42  ;;  %v2741_v21 = vsub.s32 7, %v2717_v12  ;;  %v2744_v23 = vsub.s32 %v548_v13, %v2717_v12 }
  0x4f   : > { %256 = vmax.xlane.f32.xlu0 %v255_v49 }
  0x51   : > { %1060 = vadd.xlane.f32.xlu1 %v1059_v51 }
  0x53   : > { %261 = vmax.xlane.f32.xlu0 %v260_v58 }
  0x55   : > { %1065 = vadd.xlane.f32.xlu1 %v1064_v60 }
  0x57   : > { %266 = vmax.xlane.f32.xlu0 %v265_v0 }
  0x59   : > { %1070 = vadd.xlane.f32.xlu1 %v1069_v2 }
  0x5b   : > { %271 = vmax.xlane.f32.xlu0 %v270_v7 }
  0x5d   : > { %276 = vmax.xlane.f32.xlu1 %v275_v8 }
  0xcc   : > { %v1036_v22 = vpop.xlane.xlu0 %1035 }
  0xcd   : > { %v1083_v25 = vrot.slane %v1036_v22, %v2720_v14  ;;  %v1087_v26 = vrot.slane %v1036_v22, %v2723_v15  ;;  %v1091_v27 = vrot.slane %v1036_v22, %v2726_v16  ;;  %v1095_v28 = vrot.slane %v1036_v22, %v2729_v17 }
  0xce   : > { %v1046_v24 = vpop.xlane.xlu1 %1045  ;;  %v1099_v29 = vrot.slane %v1036_v22, %v2732_v18  ;;  %v1103_v30 = vrot.slane %v1036_v22, %v2735_v19  ;;  %v1107_v31 = vrot.slane %v1036_v22, %v2738_v20  ;;  %v1111_v32 = vrot.slane %v1036_v22, %v2741_v21 }
  0xcf   : > { %v1336_v33 = vcombine.low %v1083_v25, %v1087_v26  ;;  %v1337_v34 = vcombine.low %v1091_v27, %v1095_v28  ;;  %v1147_v35 = vrot.slane %v1046_v24, %v2720_v14  ;;  %v1151_v36 = vrot.slane %v1046_v24, %v2723_v15 }
  0xd0   : > { %v1041_v37 = vpop.xlane.xlu0 %1040  ;;  %v1338_v38 = vcombine.low %v1099_v29, %v1103_v30  ;;  %v1339_v39 = vcombine.low %v1107_v31, %v1111_v32  ;;  %v1155_v40 = vrot.slane %v1046_v24, %v2726_v16  ;;  %v1159_v41 = vrot.slane %v1046_v24, %v2729_v17 }
  0xd1   : > { %v1346_v43 = vrot.slane %v1336_v33, %v2744_v23  ;;  %v1353_v44 = vrot.slane %v1337_v34, %v2744_v23  ;;  %v1115_v45 = vrot.slane %v1041_v37, %v2720_v14  ;;  %v1119_v46 = vrot.slane %v1041_v37, %v2723_v15 }
  0xd2   : > { %v2758_v42 = vpop.xlane.xlu1 %241  ;;  %v1360_v47 = vrot.slane %v1338_v38, %v2744_v23  ;;  %v1367_v48 = vrot.slane %v1339_v39, %v2744_v23  ;;  %v1123_v49 = vrot.slane %v1041_v37, %v2726_v16  ;;  %v1127_v50 = vrot.slane %v1041_v37, %v2729_v17 }
  0xd3   : > { %v1368_v51 = vcombine.low %v1346_v43, %v1353_v44  ;;  %v1131_v52 = vrot.slane %v1041_v37, %v2732_v18  ;;  %v1135_v53 = vrot.slane %v1041_v37, %v2735_v19  ;;  %v1139_v54 = vrot.slane %v1041_v37, %v2738_v20 }
  0xd4   : > { %v1369_v55 = vcombine.low %v1360_v47, %v1367_v48  ;;  %v1143_v56 = vrot.slane %v1041_v37, %v2741_v21  ;;  %v1385_v57 = vcombine.low %v1115_v45, %v1119_v46  ;;  %v1386_v58 = vcombine.low %v1123_v49, %v1127_v50 }
  0xd5   : > { %v1376_v60 = vrot.slane %v1368_v51, %v2744_v23  ;;  %v1387_v61 = vcombine.low %v1131_v52, %v1135_v53  ;;  %v1163_v62 = vrot.slane %v1046_v24, %v2732_v18  ;;  %v1167_v63 = vrot.slane %v1046_v24, %v2735_v19 }
  0xd6   : > { %v2772_v59 = vpop.xlane.xlu1 %1050  ;;  %v1383_v0 = vrot.slane %v1369_v55, %v2744_v23  ;;  %v1388_v1 = vcombine.low %v1139_v54, %v1143_v56  ;;  %v1395_v2 = vrot.slane %v1385_v57, %v2744_v23  ;;  %v1402_v3 = vrot.slane %v1386_v58, %v2744_v23 }
  0xd7   : > { %v1409_v4 = vrot.slane %v1387_v61, %v2744_v23  ;;  %v1171_v5 = vrot.slane %v1046_v24, %v2738_v20  ;;  %v1175_v6 = vrot.slane %v1046_v24, %v2741_v21  ;;  %v1434_v7 = vcombine.low %v1147_v35, %v1151_v36  ;;  %v247_v36 = vpop.xlane.xlu0 %246 }
  0xd8   : > { %v1384_v8 = vcombine.low %v1376_v60, %v1383_v0  ;;  %v1416_v10 = vrot.slane %v1388_v1, %v2744_v23  ;;  %v1417_v11 = vcombine.low %v1395_v2, %v1402_v3  ;;  %v1435_v13 = vcombine.low %v1155_v40, %v1159_v41 }
  0xd9   : > { %v1436_v22 = vcombine.low %v1163_v62, %v1167_v63  ;;  %v1437_v25 = vcombine.low %v1171_v5, %v1175_v6  ;;  %v1444_v26 = vrot.slane %v1434_v7, %v2744_v23  ;;  %v289_v27 = vrot.slane %v2758_v42, %v2720_v14 }
  0xda   : > { %1729 = vperm.xlu0 %2404, %v1384_v8   ;;  %v2787_v28 = vpop.xlane.xlu1 %1055  ;;  %v1418_v29 = vcombine.low %v1409_v4, %v1416_v10  ;;  %v1425_v30 = vrot.slane %v1417_v11, %v2744_v23  ;;  %v1451_v24 = vrot.slane %v1435_v13, %v2744_v23  ;;  %v293_v31 = vrot.slane %v2758_v42, %v2723_v15 }
  0xdb   : > { %v1458_v32 = vrot.slane %v1436_v22, %v2744_v23  ;;  %v1465_v33 = vrot.slane %v1437_v25, %v2744_v23  ;;  %v297_v34 = vrot.slane %v2758_v42, %v2726_v16  ;;  %v301_v35 = vrot.slane %v2758_v42, %v2729_v17 }
  0xdc   : > { %v1432_v37 = vrot.slane %v1418_v29, %v2744_v23  ;;  %v1466_v38 = vcombine.low %v1444_v26, %v1451_v24  ;;  %v305_v39 = vrot.slane %v2758_v42, %v2732_v18  ;;  %v309_v40 = vrot.slane %v2758_v42, %v2735_v19 }
  0xdd   : > { %v1467_v41 = vcombine.low %v1458_v32, %v1465_v33  ;;  %v313_v43 = vrot.slane %v2758_v42, %v2738_v20  ;;  %v317_v44 = vrot.slane %v2758_v42, %v2741_v21  ;;  %v542_v45 = vcombine.low %v289_v27, %v293_v31 }
  0xde   : > { %v1433_v46 = vcombine.low %v1425_v30, %v1432_v37  ;;  %v1474_v47 = vrot.slane %v1466_v38, %v2744_v23  ;;  %v543_v48 = vcombine.low %v297_v34, %v301_v35  ;;  %v544_v49 = vcombine.low %v305_v39, %v309_v40  ;;  %v1061_v54 = vpop.xlane.xlu1 %1060 }
  0xdf   : > { %v1481_v50 = vrot.slane %v1467_v41, %v2744_v23  ;;  %v545_v51 = vcombine.low %v313_v43, %v317_v44  ;;  %v552_v52 = vrot.slane %v542_v45, %v2744_v23  ;;  %v321_v53 = vrot.slane %v247_v36, %v2720_v14 }
  0xe0   : > { %1732 = vperm.xlu1 %2405, %v1433_v46   ;;  %v559_v55 = vrot.slane %v543_v48, %v2744_v23  ;;  %v566_v56 = vrot.slane %v544_v49, %v2744_v23  ;;  %v325_v42 = vrot.slane %v247_v36, %v2723_v15  ;;  %v329_v57 = vrot.slane %v247_v36, %v2726_v16 }
  0xe1   : > { %v1482_v58 = vcombine.low %v1474_v47, %v1481_v50  ;;  %v573_v60 = vrot.slane %v545_v51, %v2744_v23  ;;  %v333_v61 = vrot.slane %v247_v36, %v2729_v17  ;;  %v337_v62 = vrot.slane %v247_v36, %v2732_v18 }
  0xe2   : > { %v574_v63 = vcombine.low %v552_v52, %v559_v55  ;;  %v341_v0 = vrot.slane %v247_v36, %v2735_v19  ;;  %v345_v1 = vrot.slane %v247_v36, %v2738_v20  ;;  %v349_v2 = vrot.slane %v247_v36, %v2741_v21  ;;  %v1066_v48 = vpop.xlane.xlu1 %1065 }
  0xe3   : > { %v575_v3 = vcombine.low %v566_v56, %v573_v60  ;;  %v591_v4 = vcombine.low %v321_v53, %v325_v42  ;;  %v592_v5 = vcombine.low %v329_v57, %v333_v61  ;;  %v1243_v6 = vrot.slane %v1061_v54, %v2720_v14 }
  0xe4   : > { %1735 = vperm.xlu1 %2405, %v1482_v58   ;;  %v582_v7 = vrot.slane %v574_v63, %v2744_v23  ;;  %v593_v8 = vcombine.low %v337_v62, %v341_v0  ;;  %v594_v10 = vcombine.low %v345_v1, %v349_v2  ;;  %v1247_v11 = vrot.slane %v1061_v54, %v2723_v15 }
  0xe5   : > { %v589_v13 = vrot.slane %v575_v3, %v2744_v23  ;;  %v601_v22 = vrot.slane %v591_v4, %v2744_v23  ;;  %v608_v25 = vrot.slane %v592_v5, %v2744_v23  ;;  %v1251_v26 = vrot.slane %v1061_v54, %v2726_v16 }
  0xe6   : > { %v615_v27 = vrot.slane %v593_v8, %v2744_v23  ;;  %v622_v29 = vrot.slane %v594_v10, %v2744_v23  ;;  %v1255_v30 = vrot.slane %v1061_v54, %v2729_v17  ;;  %v1259_v24 = vrot.slane %v1061_v54, %v2732_v18  ;;  %v252_v8 = vpop.xlane.xlu0 %251 }
  0xe7   : > { %v590_v31 = vcombine.low %v582_v7, %v589_v13  ;;  %v623_v32 = vcombine.low %v601_v22, %v608_v25  ;;  %v1263_v33 = vrot.slane %v1061_v54, %v2735_v19  ;;  %v1267_v34 = vrot.slane %v1061_v54, %v2738_v20 }
  0xe8   : > { %v624_v35 = vcombine.low %v615_v27, %v622_v29  ;;  %v1271_v36 = vrot.slane %v1061_v54, %v2741_v21  ;;  %v1581_v37 = vcombine.low %v1243_v6, %v1247_v11  ;;  %v1582_v38 = vcombine.low %v1251_v26, %v1255_v30 }
  0xe9   : > { %935 = vperm.xlu1 %2405, %v590_v31   ;;  %v631_v39 = vrot.slane %v623_v32, %v2744_v23  ;;  %v1583_v40 = vcombine.low %v1259_v24, %v1263_v33  ;;  %v1179_v41 = vrot.slane %v2772_v59, %v2720_v14  ;;  %v1183_v43 = vrot.slane %v2772_v59, %v2723_v15 }
  0xea   : > { %v638_v44 = vrot.slane %v624_v35, %v2744_v23  ;;  %v1584_v45 = vcombine.low %v1267_v34, %v1271_v36  ;;  %v1591_v46 = vrot.slane %v1581_v37, %v2744_v23  ;;  %v1598_v47 = vrot.slane %v1582_v38, %v2744_v23 }
  0xeb   : > { %v1605_v49 = vrot.slane %v1583_v40, %v2744_v23  ;;  %v1187_v50 = vrot.slane %v2772_v59, %v2726_v16  ;;  %v1191_v51 = vrot.slane %v2772_v59, %v2729_v17  ;;  %v1195_v52 = vrot.slane %v2772_v59, %v2732_v18 }
  0xec   : > { %v639_v53 = vcombine.low %v631_v39, %v638_v44  ;;  %v1612_v54 = vrot.slane %v1584_v45, %v2744_v23  ;;  %v1613_v55 = vcombine.low %v1591_v46, %v1598_v47  ;;  %v1199_v56 = vrot.slane %v2772_v59, %v2735_v19 }
  0xed   : > { %v1203_v42 = vrot.slane %v2772_v59, %v2738_v20  ;;  %v1207_v57 = vrot.slane %v2772_v59, %v2741_v21  ;;  %v1483_v58 = vcombine.low %v1179_v41, %v1183_v43  ;;  %v1484_v60 = vcombine.low %v1187_v50, %v1191_v51  ;;  %v1071_v41 = vpop.xlane.xlu1 %1070 }
  0xee   : > { %938 = vperm.xlu1 %2405, %v639_v53   ;;  %v1614_v61 = vcombine.low %v1605_v49, %v1612_v54  ;;  %v1621_v62 = vrot.slane %v1613_v55, %v2744_v23  ;;  %v1485_v63 = vcombine.low %v1195_v52, %v1199_v56  ;;  %v1275_v0 = vrot.slane %v1066_v48, %v2720_v14 }
  0xef   : > { %v1486_v1 = vcombine.low %v1203_v42, %v1207_v57  ;;  %v1493_v2 = vrot.slane %v1483_v58, %v2744_v23  ;;  %v1500_v3 = vrot.slane %v1484_v60, %v2744_v23  ;;  %v1279_v4 = vrot.slane %v1066_v48, %v2723_v15 }
  0xf0   : > { %v1628_v5 = vrot.slane %v1614_v61, %v2744_v23  ;;  %v1507_v59 = vrot.slane %v1485_v63, %v2744_v23  ;;  %v1283_v6 = vrot.slane %v1066_v48, %v2726_v16  ;;  %v1287_v7 = vrot.slane %v1066_v48, %v2729_v17 }
  0xf1   : > { %v1514_v10 = vrot.slane %v1486_v1, %v2744_v23  ;;  %v1515_v11 = vcombine.low %v1493_v2, %v1500_v3  ;;  %v1291_v13 = vrot.slane %v1066_v48, %v2732_v18  ;;  %v1295_v22 = vrot.slane %v1066_v48, %v2735_v19 }
  0xf2   : > { %v1629_v25 = vcombine.low %v1621_v62, %v1628_v5  ;;  %v1299_v26 = vrot.slane %v1066_v48, %v2738_v20  ;;  %v1303_v27 = vrot.slane %v1066_v48, %v2741_v21  ;;  %v1630_v29 = vcombine.low %v1275_v0, %v1279_v4 }
  0xf3   : > { %v1516_v30 = vcombine.low %v1507_v59, %v1514_v10  ;;  %v1523_v24 = vrot.slane %v1515_v11, %v2744_v23  ;;  %v1631_v31 = vcombine.low %v1283_v6, %v1287_v7  ;;  %v1632_v32 = vcombine.low %v1291_v13, %v1295_v22 }
  0xf4   : > { %1744 = vperm.xlu0 %2404, %v1629_v25   ;;  %v1633_v33 = vcombine.low %v1299_v26, %v1303_v27  ;;  %v1640_v34 = vrot.slane %v1630_v29, %v2744_v23  ;;  %v353_v35 = vrot.slane %v252_v8, %v2720_v14  ;;  %v357_v36 = vrot.slane %v252_v8, %v2723_v15 }
  0xf5   : > { %v1530_v37 = vrot.slane %v1516_v30, %v2744_v23  ;;  %v1647_v38 = vrot.slane %v1631_v31, %v2744_v23  ;;  %v1654_v39 = vrot.slane %v1632_v32, %v2744_v23  ;;  %v361_v40 = vrot.slane %v252_v8, %v2726_v16 }
  0xf6   : > { %v1661_v43 = vrot.slane %v1633_v33, %v2744_v23  ;;  %v365_v44 = vrot.slane %v252_v8, %v2729_v17  ;;  %v369_v45 = vrot.slane %v252_v8, %v2732_v18  ;;  %v373_v46 = vrot.slane %v252_v8, %v2735_v19 }
  0xf7   : > { %v1531_v47 = vcombine.low %v1523_v24, %v1530_v37  ;;  %v1662_v48 = vcombine.low %v1640_v34, %v1647_v38  ;;  %v377_v49 = vrot.slane %v252_v8, %v2738_v20  ;;  %v381_v50 = vrot.slane %v252_v8, %v2741_v21  ;;  %v277_v24 = vpop.xlane.xlu1 %276 }
  0xf8   : > { %v1663_v51 = vcombine.low %v1654_v39, %v1661_v43  ;;  %v640_v52 = vcombine.low %v353_v35, %v357_v36  ;;  %v641_v53 = vcombine.low %v361_v40, %v365_v44  ;;  %v642_v54 = vcombine.low %v369_v45, %v373_v46  ;;  %v257_v44 = vpop.xlane.xlu0 %256 }
  0xf9   : > { %1738 = vperm.xlu1 %2405, %v1531_v47   ;;  %v1670_v55 = vrot.slane %v1662_v48, %v2744_v23  ;;  %v643_v56 = vcombine.low %v377_v49, %v381_v50  ;;  %v1307_v42 = vrot.slane %v1071_v41, %v2720_v14  ;;  %v1311_v57 = vrot.slane %v1071_v41, %v2723_v15 }
  0xfa   : > { %v1677_v58 = vrot.slane %v1663_v51, %v2744_v23  ;;  %v650_v60 = vrot.slane %v640_v52, %v2744_v23  ;;  %v657_v61 = vrot.slane %v641_v53, %v2744_v23  ;;  %v664_v62 = vrot.slane %v642_v54, %v2744_v23 }
  0xfb   : > { %v671_v63 = vrot.slane %v643_v56, %v2744_v23  ;;  %v1315_v0 = vrot.slane %v1071_v41, %v2726_v16  ;;  %v1319_v1 = vrot.slane %v1071_v41, %v2729_v17  ;;  %v1323_v2 = vrot.slane %v1071_v41, %v2732_v18 }
  0xfc   : > { %v1678_v3 = vcombine.low %v1670_v55, %v1677_v58  ;;  %v672_v4 = vcombine.low %v650_v60, %v657_v61  ;;  %v1327_v5 = vrot.slane %v1071_v41, %v2735_v19  ;;  %v1331_v59 = vrot.slane %v1071_v41, %v2738_v20 }
  0xfd   : > { %v673_v6 = vcombine.low %v664_v62, %v671_v63  ;;  %v1335_v7 = vrot.slane %v1071_v41, %v2741_v21  ;;  %v1679_v8 = vcombine.low %v1307_v42, %v1311_v57  ;;  %v1680_v10 = vcombine.low %v1315_v0, %v1319_v1 }
  0xfe   : > { %1747 = vperm.xlu0 %2404, %v1678_v3   ;;  %v680_v11 = vrot.slane %v672_v4, %v2744_v23  ;;  %v1681_v13 = vcombine.low %v1323_v2, %v1327_v5  ;;  %v1211_v22 = vrot.slane %v2787_v28, %v2720_v14  ;;  %v1215_v25 = vrot.slane %v2787_v28, %v2723_v15  ;;  %v262_v4 = vpop.xlane.xlu0 %261 }
  0xff   : > { %v687_v26 = vrot.slane %v673_v6, %v2744_v23  ;;  %v1682_v27 = vcombine.low %v1331_v59, %v1335_v7  ;;  %v1689_v29 = vrot.slane %v1679_v8, %v2744_v23  ;;  %v1696_v30 = vrot.slane %v1680_v10, %v2744_v23 }
 0x100   : > { %v1703_v31 = vrot.slane %v1681_v13, %v2744_v23  ;;  %v1219_v32 = vrot.slane %v2787_v28, %v2726_v16  ;;  %v1223_v33 = vrot.slane %v2787_v28, %v2729_v17  ;;  %v1227_v34 = vrot.slane %v2787_v28, %v2732_v18 }
 0x101   : > { %v688_v35 = vcombine.low %v680_v11, %v687_v26  ;;  %v1710_v36 = vrot.slane %v1682_v27, %v2744_v23  ;;  %v1711_v37 = vcombine.low %v1689_v29, %v1696_v30  ;;  %v1231_v38 = vrot.slane %v2787_v28, %v2735_v19 }
 0x102   : > { %v1235_v39 = vrot.slane %v2787_v28, %v2738_v20  ;;  %v1239_v40 = vrot.slane %v2787_v28, %v2741_v21  ;;  %v1532_v41 = vcombine.low %v1211_v22, %v1215_v25  ;;  %v1533_v43 = vcombine.low %v1219_v32, %v1223_v33 }
 0x103   : > { %941 = vperm.xlu1 %2405, %v688_v35   ;;  %v1712_v45 = vcombine.low %v1703_v31, %v1710_v36  ;;  %v1719_v46 = vrot.slane %v1711_v37, %v2744_v23  ;;  %v1534_v47 = vcombine.low %v1227_v34, %v1231_v38  ;;  %v513_v48 = vrot.slane %v277_v24, %v2720_v14 }
 0x104   : > { %v1535_v49 = vcombine.low %v1235_v39, %v1239_v40  ;;  %v1542_v50 = vrot.slane %v1532_v41, %v2744_v23  ;;  %v1549_v51 = vrot.slane %v1533_v43, %v2744_v23  ;;  %v517_v52 = vrot.slane %v277_v24, %v2723_v15  ;;  %v267_v40 = vpop.xlane.xlu0 %266 }
 0x105   : > { %v1726_v53 = vrot.slane %v1712_v45, %v2744_v23  ;;  %v1556_v28 = vrot.slane %v1534_v47, %v2744_v23  ;;  %v521_v54 = vrot.slane %v277_v24, %v2726_v16  ;;  %v525_v55 = vrot.slane %v277_v24, %v2729_v17 }
 0x106   : > { %v1563_v56 = vrot.slane %v1535_v49, %v2744_v23  ;;  %v1564_v42 = vcombine.low %v1542_v50, %v1549_v51  ;;  %v529_v57 = vrot.slane %v277_v24, %v2732_v18  ;;  %v533_v58 = vrot.slane %v277_v24, %v2735_v19 }
 0x107   : > { %v1727_v60 = vcombine.low %v1719_v46, %v1726_v53  ;;  %v537_v61 = vrot.slane %v277_v24, %v2738_v20  ;;  %v541_v62 = vrot.slane %v277_v24, %v2741_v21  ;;  %v885_v63 = vcombine.low %v513_v48, %v517_v52 }
 0x108   : > { %v1565_v0 = vcombine.low %v1556_v28, %v1563_v56  ;;  %v1572_v1 = vrot.slane %v1564_v42, %v2744_v23  ;;  %v886_v2 = vcombine.low %v521_v54, %v525_v55  ;;  %v887_v3 = vcombine.low %v529_v57, %v533_v58 }
 0x109   : > { %1750 = vperm.xlu0 %2404, %v1727_v60   ;;  %v888_v5 = vcombine.low %v537_v61, %v541_v62  ;;  %v895_v59 = vrot.slane %v885_v63, %v2744_v23  ;;  %v385_v6 = vrot.slane %v257_v44, %v2720_v14  ;;  %v389_v7 = vrot.slane %v257_v44, %v2723_v15 }
 0x10a   : > { %v1579_v8 = vrot.slane %v1565_v0, %v2744_v23  ;;  %v902_v10 = vrot.slane %v886_v2, %v2744_v23  ;;  %v909_v11 = vrot.slane %v887_v3, %v2744_v23  ;;  %v393_v13 = vrot.slane %v257_v44, %v2726_v16 }
 0x10b   : > { %v916_v22 = vrot.slane %v888_v5, %v2744_v23  ;;  %v397_v25 = vrot.slane %v257_v44, %v2729_v17  ;;  %v401_v26 = vrot.slane %v257_v44, %v2732_v18  ;;  %v405_v27 = vrot.slane %v257_v44, %v2735_v19 }
 0x10c   : > { %v1580_v29 = vcombine.low %v1572_v1, %v1579_v8  ;;  %v917_v30 = vcombine.low %v895_v59, %v902_v10  ;;  %v409_v24 = vrot.slane %v257_v44, %v2738_v20  ;;  %v413_v31 = vrot.slane %v257_v44, %v2741_v21  ;;  %v272_v1 = vpop.xlane.xlu0 %271 }
 0x10d   : > { %v918_v32 = vcombine.low %v909_v11, %v916_v22  ;;  %v689_v33 = vcombine.low %v385_v6, %v389_v7  ;;  %v690_v34 = vcombine.low %v393_v13, %v397_v25  ;;  %v691_v35 = vcombine.low %v401_v26, %v405_v27 }
 0x10e   : > { %1741 = vperm.xlu1 %2405, %v1580_v29   ;;  %v925_v36 = vrot.slane %v917_v30, %v2744_v23  ;;  %v692_v37 = vcombine.low %v409_v24, %v413_v31  ;;  %v417_v38 = vrot.slane %v262_v4, %v2720_v14  ;;  %v421_v39 = vrot.slane %v262_v4, %v2723_v15 }
 0x10f   : > { %v932_v41 = vrot.slane %v918_v32, %v2744_v23  ;;  %v699_v43 = vrot.slane %v689_v33, %v2744_v23  ;;  %v706_v45 = vrot.slane %v690_v34, %v2744_v23  ;;  %v713_v44 = vrot.slane %v691_v35, %v2744_v23 }
 0x110   : > { %v720_v46 = vrot.slane %v692_v37, %v2744_v23  ;;  %v425_v47 = vrot.slane %v262_v4, %v2726_v16  ;;  %v429_v48 = vrot.slane %v262_v4, %v2729_v17  ;;  %v433_v49 = vrot.slane %v262_v4, %v2732_v18 }
 0x111   : > { %v933_v50 = vcombine.low %v925_v36, %v932_v41  ;;  %v721_v51 = vcombine.low %v699_v43, %v706_v45  ;;  %v437_v52 = vrot.slane %v262_v4, %v2735_v19  ;;  %v441_v53 = vrot.slane %v262_v4, %v2738_v20 }
 0x112   : > { %v722_v28 = vcombine.low %v713_v44, %v720_v46  ;;  %v445_v54 = vrot.slane %v262_v4, %v2741_v21  ;;  %v738_v55 = vcombine.low %v417_v38, %v421_v39  ;;  %v739_v56 = vcombine.low %v425_v47, %v429_v48 }
 0x113   : > { %956 = vperm.xlu0 %2404, %v933_v50   ;;  %v729_v42 = vrot.slane %v721_v51, %v2744_v23  ;;  %v740_v57 = vcombine.low %v433_v49, %v437_v52  ;;  %v449_v58 = vrot.slane %v267_v40, %v2720_v14  ;;  %v453_v60 = vrot.slane %v267_v40, %v2723_v15  ;;  %v1814_v51 = vld [vmem:[%s3133_s1] sm:$0xff]  ;;  %v1815_v52 = vld [vmem:[%s3133_s1 + $0x8] sm:$0xff] }
 0x114   : > { %v736_v61 = vrot.slane %v722_v28, %v2744_v23  ;;  %v741_v62 = vcombine.low %v441_v53, %v445_v54  ;;  %v748_v63 = vrot.slane %v738_v55, %v2744_v23  ;;  %v755_v0 = vrot.slane %v739_v56, %v2744_v23  ;;  %v1816_v54 = vld [vmem:[%s3133_s1 + $0x10] sm:$0xff]  ;;  %v1817_v55 = vld [vmem:[%s3133_s1 + $0x18] sm:$0xff] }
 0x115   : > { %v762_v2 = vrot.slane %v740_v57, %v2744_v23  ;;  %v457_v3 = vrot.slane %v267_v40, %v2726_v16  ;;  %v461_v4 = vrot.slane %v267_v40, %v2729_v17  ;;  %v465_v5 = vrot.slane %v267_v40, %v2732_v18 }
 0x116   : > { %v737_v59 = vcombine.low %v729_v42, %v736_v61  ;;  %v769_v6 = vrot.slane %v741_v62, %v2744_v23  ;;  %v770_v7 = vcombine.low %v748_v63, %v755_v0  ;;  %v469_v8 = vrot.slane %v267_v40, %v2735_v19  ;;  %v1819_v61 = vld [vmem:[%s3133_s1 + $0x28] sm:$0xff] }
 0x117   : > { %v473_v10 = vrot.slane %v267_v40, %v2738_v20  ;;  %v477_v11 = vrot.slane %v267_v40, %v2741_v21  ;;  %v787_v13 = vcombine.low %v449_v58, %v453_v60  ;;  %v788_v22 = vcombine.low %v457_v3, %v461_v4  ;;  %v1818_v60 = vld [vmem:[%s3133_s1 + $0x20] sm:$0xff] }
 0x118   : > { %944 = vperm.xlu1 %2405, %v737_v59   ;;  %v771_v25 = vcombine.low %v762_v2, %v769_v6  ;;  %v778_v26 = vrot.slane %v770_v7, %v2744_v23  ;;  %v789_v27 = vcombine.low %v465_v5, %v469_v8  ;;  %v481_v29 = vrot.slane %v272_v1, %v2720_v14  ;;  %v1821_v2 = vld [vmem:[%s3133_s1 + $0x38] sm:$0xff] }
 0x119   : > { %v790_v30 = vcombine.low %v473_v10, %v477_v11  ;;  %v797_v24 = vrot.slane %v787_v13, %v2744_v23  ;;  %v804_v31 = vrot.slane %v788_v22, %v2744_v23  ;;  %v485_v32 = vrot.slane %v272_v1, %v2723_v15 }
 0x11a   : > { %v785_v33 = vrot.slane %v771_v25, %v2744_v23  ;;  %v811_v34 = vrot.slane %v789_v27, %v2744_v23  ;;  %v489_v35 = vrot.slane %v272_v1, %v2726_v16  ;;  %v493_v36 = vrot.slane %v272_v1, %v2729_v17 }
 0x11b   : > { %v818_v37 = vrot.slane %v790_v30, %v2744_v23  ;;  %v819_v38 = vcombine.low %v797_v24, %v804_v31  ;;  %v497_v14 = vrot.slane %v272_v1, %v2732_v18  ;;  %v501_v39 = vrot.slane %v272_v1, %v2735_v19 }
 0x11c   : > { %v786_v40 = vcombine.low %v778_v26, %v785_v33  ;;  %v505_v41 = vrot.slane %v272_v1, %v2738_v20  ;;  %v509_v15 = vrot.slane %v272_v1, %v2741_v21  ;;  %v836_v43 = vcombine.low %v481_v29, %v485_v32  ;;  %v1820_v1 = vld [vmem:[%s3133_s1 + $0x30] sm:$0xff] }
 0x11d   : > { %v820_v45 = vcombine.low %v811_v34, %v818_v37  ;;  %v827_v44 = vrot.slane %v819_v38, %v2744_v23  ;;  %v837_v46 = vcombine.low %v489_v35, %v493_v36  ;;  %v838_v16 = vcombine.low %v497_v14, %v501_v39 }
 0x11e   : > { %947 = vperm.xlu1 %2405, %v786_v40   ;;  %v839_v17 = vcombine.low %v505_v41, %v509_v15  ;;  %v846_v47 = vrot.slane %v836_v43, %v2744_v23  ;;  %v2307_v56 = vpack.c.bf16 %v1815_v52, %v1814_v51  ;;  %v2529_v57 = vmov 0.0|0.0  }
 0x11f   : > { %v834_v48 = vrot.slane %v820_v45, %v2744_v23  ;;  %v853_v18 = vrot.slane %v837_v46, %v2744_v23  ;;  %v860_v19 = vrot.slane %v838_v16, %v2744_v23  ;;  %2318 = vmatprep.subr.bf16.mxu1 %v2529_v57  ;;  %2306 = vmatprep.subr.bf16.mxu0 %v2529_v57  ;;  %v2530_v62 = vmov -inf  }
 0x120   : > { %v867_v20 = vrot.slane %v839_v17, %v2744_v23  ;;  %2320 = vmatpush3.bf16.msra.mxu1 %v2307_v56  ;;  %v2310_v58 = vpack.c.bf16 %v1817_v55, %v1816_v54  ;;  %2308 = vmatpush3.bf16.msra.mxu0 %v2307_v56  ;;  %210 = vst.msk [vmem:[#allocation2] sm:$0x1] %vm209_vm1, %v2530_v62  ;;  %v2531_v63 = vmov 0.0   ;;  %v959_v7 = vand.u32 127, %v286_v9 }
 0x121   : > { %v835_v49 = vcombine.low %v827_v44, %v834_v48  ;;  %v868_v21 = vcombine.low %v846_v47, %v853_v18  ;;  %2321 = vmatprep.subr.bf16.mxu1 %v2529_v57  ;;  %211 = vst.msk [vmem:[#allocation3] sm:$0x1] %vm209_vm1, %v2531_v63  ;;  %2309 = vmatprep.subr.bf16.mxu0 %v2529_v57 }
 0x122   : > { %v869_v50 = vcombine.low %v860_v19, %v867_v20  ;;  %v2313_v0 = vpack.c.bf16 %v1819_v61, %v1818_v60  ;;  %2293 = vmatprep.mubr.msk.f32.mxu1 %vm2532_vm2, %v2531_v63  ;;  %2274 = vmatprep.mubr.msk.f32.mxu0 %vm2532_vm2, %v2531_v63  ;;  %v2316_v3 = vpack.c.bf16 %v1821_v2, %v1820_v1  ;;  %v964_v10 = vadd.s32 4294967288, %v959_v7 }
 0x123   : > { %950 = vperm.xlu1 %2405, %v835_v49   ;;  %v876_v53 = vrot.slane %v868_v21, %v2744_v23  ;;  %v971_v13 = vadd.s32 4294967280, %v959_v7  ;;  %v978_v22 = vadd.s32 4294967272, %v959_v7  ;;  %v992_v27 = vadd.s32 4294967256, %v959_v7 }
 0x124   : > { %v883_v28 = vrot.slane %v869_v50, %v2744_v23  ;;  %2323 = vmatpush3.bf16.msra.mxu1 %v2310_v58  ;;  %2311 = vmatpush3.bf16.msra.mxu0 %v2310_v58  ;;  %v967_v26 = vsub.s32 %v964_v10, %v2717_v12  ;;  %v999_v30 = vadd.s32 4294967248, %v959_v7  ;;  %v985_v24 = vadd.s32 4294967264, %v959_v7 }
 0x125   : > { %2324 = vmatprep.subr.bf16.mxu1 %v2529_v57  ;;  %2312 = vmatprep.subr.bf16.mxu0 %v2529_v57  ;;  %v974_v29 = vsub.s32 %v971_v13, %v2717_v12  ;;  %v962_v31 = vsub.s32 %v959_v7, %v2717_v12  ;;  %v981_v32 = vsub.s32 %v978_v22, %v2717_v12  ;;  %v1006_v35 = vadd.s32 4294967240, %v959_v7 }
 0x126   : > { %v884_v42 = vcombine.low %v876_v53, %v883_v28  ;;  %v995_v9 = vsub.s32 %v992_v27, %v2717_v12  ;;  %v1002_v37 = vsub.s32 %v999_v30, %v2717_v12  ;;  %v988_v14 = vsub.s32 %v985_v24, %v2717_v12 }
 0x127   : > { %v1009_v43 = vsub.s32 %v1006_v35, %v2717_v12 }
 0x128   : > { %953 = vperm.xlu1 %2405, %v884_v42   ;;  %2326 = vmatpush3.bf16.msra.mxu1 %v2313_v0  ;;  %v1031_v21 = vld [vmem:[#allocation3] sm:$0x1] }
 0x129   : > { %2314 = vmatpush3.bf16.msra.mxu0 %v2313_v0  ;;  %2327 = vmatprep.subr.bf16.mxu1 %v2529_v57 }
 0x12a   : > { %2315 = vmatprep.subr.bf16.mxu0 %v2529_v57 }
 0x12c   : > { %2329 = vmatpush3.bf16.msra.mxu1 %v2316_v3 }
 0x12d   : > { %2317 = vmatpush3.bf16.msra.mxu0 %v2316_v3  ;;  %2296 = vmatprep.subr.mxu1 %v2531_v63 }
 0x12e   : > { %2301 = vmatprep.subr.mxu0 %v2531_v63 }
 0x159   : > { %v1730_v8 = vpop.permute.xlu0 %1729 }
 0x15a   : > { %v1755_v39 = vrot.slane %v1730_v8, %v962_v31 }
 0x15f   : > { %v1733_v4 = vpop.permute.xlu1 %1732 }
 0x160   : > { %v1759_v34 = vrot.slane %v1733_v4, %v967_v26 }
 0x162   : > { %v1760_v41 = vsel %vm969_vm3, %v1759_v34, %v1755_v39 }
 0x163   : > { %v1736_v5 = vpop.permute.xlu1 %1735 }
 0x164   : > { %v1764_v36 = vrot.slane %v1736_v5, %v974_v29 }
 0x166   : > { %v1765_v44 = vsel %vm976_vm4, %v1764_v36, %v1760_v41 }
 0x168   : > { %v3033_v59 = vpop.permute.xlu1 %935 }
 0x169   : > { %v963_v57 = vrot.slane %v3033_v59, %v962_v31 }
 0x16d   : > { %v3035_v6 = vpop.permute.xlu1 %938 }
 0x16e   : > { %v968_v28 = vrot.slane %v3035_v6, %v967_v26  ;;  %v1822_v26 = vld [vmem:[%s3134_s2] sm:$0xf] }
 0x170   : > { %v970_v61 = vsel %vm969_vm3, %v968_v28, %v963_v57 }
 0x173   : > { %v1745_v25 = vpop.permute.xlu0 %1744 }
 0x174   : > { %v1779_v15 = vrot.slane %v1745_v25, %v995_v9 }
 0x178   : > { %v1739_v11 = vpop.permute.xlu1 %1738 }
 0x179   : > { %v1769_v40 = vrot.slane %v1739_v11, %v981_v32  ;;  %v236_v11 = vld [vmem:[#allocation2] sm:$0x1] }
 0x17b   : > { %v1770_v17 = vsel %vm983_vm5, %v1769_v40, %v1765_v44 }
 0x17d   : > { %v1748_v38 = vpop.permute.xlu0 %1747 }
 0x17e   : > { %v1784_v46 = vrot.slane %v1748_v38, %v1002_v37 }
 0x182   : > { %v942_v33 = vpop.permute.xlu1 %941 }
 0x183   : > { %v975_v55 = vrot.slane %v942_v33, %v974_v29 }
 0x185   : > { %v977_v0 = vsel %vm976_vm4, %v975_v55, %v970_v61 }
 0x188   : > { %v1751_v47 = vpop.permute.xlu0 %1750 }
 0x189   : > { %v1789_v18 = vrot.slane %v1751_v47, %v1009_v43 }
 0x18d   : > { %v1742_v45 = vpop.permute.xlu1 %1741 }
 0x18e   : > { %v1774_v16 = vrot.slane %v1742_v45, %v988_v14 }
 0x190   : > { %v1775_v48 = vsel %vm990_vm6, %v1774_v16, %v1770_v17 }
 0x191   : > { %v1780_v19 = vsel %vm997_vm7, %v1779_v15, %v1775_v48 }
 0x192   : > { %v1785_v20 = vsel %vm1004_vm8, %v1784_v46, %v1780_v19  ;;  %v957_v1 = vpop.permute.xlu0 %956 }
 0x193   : > { %v1790_v12 = vsel %vm1011_vm9, %v1789_v18, %v1785_v20  ;;  %v1010_v59 = vrot.slane %v957_v1, %v1009_v43 }
 0x194   : > { %v1797_v49 = vrot.slane %v1790_v12, %v2744_v23 }
 0x196   : > { %v1804_v50 = vrot.slane %v1797_v49, %v2744_v23 }
 0x197   : > { %v945_v51 = vpop.permute.xlu1 %944 }
 0x198   : > { %v1806_v52 = vadd.f32 %v1804_v50, %v1031_v21  ;;  %v982_v58 = vrot.slane %v945_v51, %v981_v32 }
 0x19a   : > { %1807 = vst.msk [vmem:[#allocation3] sm:$0x1] %vm209_vm1, %v1806_v52  ;;  %v984_v2 = vsel %vm983_vm5, %v982_v58, %v977_v0 }
 0x19d   : > { %v948_v53 = vpop.permute.xlu1 %947 }
 0x19e   : > { %v989_v60 = vrot.slane %v948_v53, %v988_v14 }
 0x1a0   : > { %v991_v4 = vsel %vm990_vm6, %v989_v60, %v984_v2 }
 0x1a1   : > { %v1812_v54 = vld [vmem:[#allocation3] sm:$0x1] }
 0x1a2   : > { %v951_v56 = vpop.permute.xlu1 %950  ;;  %v1813_v42 = vmul.f32 0.0030864198, %v1812_v54 }
 0x1a3   : > { %v996_v62 = vrot.slane %v951_v56, %v995_v9 }
 0x1a4   : > { %2294 = vmatmul.mubr.msk.f32.vlgmr.msra.gmra.mrb[0].mxu1 %vm1823_vm10, %v1813_v42 }
 0x1a5   : > { %2298 = vmatprep.mubr.msk.f32.mxu1 %vm2532_vm2, %v2531_v63  ;;  %v998_v6 = vsel %vm997_vm7, %v996_v62, %v991_v4  ;;  %2297 = vmatpush3.msk.msra.mxu1 %vm1976_vm11, %v1822_v26 }
 0x1a7   : > { %v954_v3 = vpop.permute.xlu1 %953 }
 0x1a8   : > { %v1003_v5 = vrot.slane %v954_v3, %v1002_v37 }
 0x1aa   : > { %v1005_v7 = vsel %vm1004_vm8, %v1003_v5, %v998_v6 }
 0x1ab   : > { %v1012_v8 = vsel %vm1011_vm9, %v1010_v59, %v1005_v7 }
 0x1ac   : > { %v1019_v10 = vrot.slane %v1012_v8, %v2744_v23 }
 0x1ae   : > { %v1026_v13 = vrot.slane %v1019_v10, %v2744_v23 }
 0x1b0   : > { %v1028_v22 = vmax.f32 %v236_v11, %v1026_v13 }
 0x1b2   : > { %1030 = vst.msk [vmem:[#allocation2] sm:$0x1] %vm209_vm1, %v1028_v22 }
 0x1b9   : > { %v1811_v25 = vld [vmem:[#allocation2] sm:$0x1] }
 0x1ba   : > { %2275 = vmatmul.mubr.msk.f32.vlgmr.msra.gmra.mrb[0].mxu0 %vm1823_vm10, %v1811_v25 }
 0x1bb   : > { %2303 = vmatprep.mubr.msk.f32.mxu0 %vm2532_vm2, %v2531_v63  ;;  %2302 = vmatpush3.msk.msra.mxu0 %vm1976_vm11, %v1822_v26 }
 0x277   : > { %v1967_v27 = vpop.f32.mrb[0].mxu1 }
 0x278   : > { %v1971_v29 = vmax.f32 %v1967_v27, 0.0  ;;  %v2295_v23 = vpop.f32.mrb[1].mxu1 }
 0x27a   : > { %2299 = vmatmul.mubr.msk.f32.vlgmr.msra.gmra.mrb[2].mxu1 %vm1972_vm12, %v1971_v29 }
 0x28d   : > { %v1893_v30 = vpop.f32.mrb[0].mxu0 }
 0x28e   : > { %v1897_v24 = vmax.f32 %v1893_v30, 0.0  ;;  %v2276_v31 = vpop.f32.mrb[1].mxu0 }
 0x290   : > { %2304 = vmatmul.mubr.msk.f32.vlgmr.msra.gmra.mrb[2].mxu0 %vm1972_vm12, %v1897_v24 }
 0x34d   : > { %v2046_v32 = vpop.f32.mrb[2].mxu1 }
 0x34e   : > { %v2300_v63 = vpop.f32.mrb[3].mxu1 }
 0x363   : > { %v2119_v33 = vpop.f32.mrb[2].mxu0 }
 0x364   : > { %v2120_v34 = vadd.f32 %v2119_v33, %v2046_v32  ;;  %v2305_v9 = vpop.f32.mrb[3].mxu0 }
 0x366   : > { %v2232_v35 = vmul.f32 -1.442695, %v2120_v34 }
 0x368   : > { %2406 = vpow2.f32 %v2232_v35 }
 0x372   : > { %v2407_v36 = vpop.eup %2406 }
 0x373   : > { %v2126_v37 = vadd.f32 1.0, %v2407_v36 }
 0x375   : > { %2408 = vrcp.f32 %v2126_v37 }
 0x37f   : > { %v2409_v38 = vpop.eup %2408 }
 0x380   : > { %2129 = vst.msk [vmem:[%s203_s9] sm:$0x1] %vm209_vm1, %v2409_v38 }
 0x381   : > { %2453 = shalt.err (!%p2450_p4)
}
 0x382   : > { %s2454_s11 = scalar_lea.hbm %s3082_s28, 16  ;;  %s2458_s19 = scalar_lea.hbm %s3135_s3, 32 }
 0x383   : > { %p2455_p6 = scmp.ne.s32.totalorder %s3082_s28, %s2454_s11  ;;  %p2459_p12 = scmp.lt.u32.totalorder %s3082_s28, %s3135_s3 }
 0x384   : > { %p2460_p1 = scmp.lt.u32.totalorder %s2458_s19, %s2454_s11  ;;  %p2462_p8 = scmp.lt.u32.totalorder %s2454_s11, %s3082_s28 }
 0x385   : > { %p2456_p7 = pnand %p2455_p6, %p3143_p9 }
 0x386   : > { %p2461_p3 = por %p2460_p1, %p2459_p12 }
 0x387   : > { %p2457_p10 = pneg %p2456_p7 }
 0x388   : > { %p2463_p11 = por %p2462_p8, %p2461_p3 }
 0x38a   : > { %p2464_p0 = pnand %p2463_p11, %p2457_p10 }
 0x38c   : > { %2467 = shalt.err (!%p2464_p0)
}
 0x38d   : > { %2336 = dma.vmem_to_hbm [thread:$0]  (%p3143_p9), %s3084_s10, 16, %s3082_s28, %s2131_s29  }
 0x38e PF: > { %s2155_s4 = sand.u32 1, %s2502_s12   ;;  %p3144_p5 = scmp.ne.s32.totalorder %s3140_s27, 0 }
 0x38f   : > { %p3145_p13 = scmp.ge.s32.totalorder %s2522_s17, 2  ;;  %s2156_s7 = scalar_lea.sflag [#allocation6], %s2155_s4 }
 0x391   : > { %p2343_p2 = pnand %p3145_p13, %p3144_p5 }
 0x393   : > { %2497 = dma.done.wait (!%p2343_p2), %s2156_s7, 16  }
 0x394   : > { %2499 = vsyncadd (!%p2343_p2), %s2156_s7, 4294967280  ;;  %s19_s17 = sadd.s32 1, %s2522_s17   ;;  %s3146_s12 = smov %s2506_s13 }
 0x395   : > { %p16_p4 = scmp.ge.s32.totalorder %s19_s17, 4   ;;  %s3147_s13 = smov %s2510_s14 }
 0x396   : > { %s3148_s14 = smov %s2610_s26  ;;  %s3149_s15 = smov %s2518_s16 }
 0x397   : > { %s3150_s16 = smov %s3152_s20  ;;  %18 = sbr.rel (!%p16_p4) target bundleno = 6 (0x6), region = 85 }
 0x39e   :  { %2160 = vsyncpa [#allocation5], 1 }
 0x39f   :  { %2162 = vsyncpa [#allocation5 + $0x1], 1 }
 0x3a0   :  { %2163 = vsyncpa [#allocation6], 1 }
 0x3a1   :  { %2165 = vsyncpa [#allocation6 + $0x1], 1 }

</bundles_post_ra>
